<compile_context>
chip_gen: v7x
topology: tpu7x:2x2x1
jax: 0.10.0
libtpu: 0.0.40
codegen_flags: <defaults>
</compile_context>

<pallas_src>
import functools

import jax
import jax.numpy as jnp
from jax.experimental import pallas as pl
from jax.experimental.pallas import tpu as pltpu


def _pe_angle_kernel(x_ref, inv_ref, o_ref, *, res):
    # x_ref  : (row_tile, 1)        f32 — raw (unclamped) positions, one per row
    # inv_ref: (2, d_model)         f32 — row 0: table for pos < 0, row 1: pos >= 0
    # o_ref  : (row_tile, d_model)  f32
    rows = x_ref.shape[0]
    d = inv_ref.shape[1]
    shape = (rows, d)

    pos = jnp.clip(x_ref[...], -float(res), float(res))        # (rows, 1)
    abs_pos = jnp.broadcast_to(jnp.abs(pos), shape)             # (rows, d)
    nonneg = jnp.broadcast_to(pos >= 0.0, shape)                # (rows, d) bool

    inv_neg = jnp.broadcast_to(inv_ref[0:1, :], shape)          # pos < 0 table
    inv_pos = jnp.broadcast_to(inv_ref[1:2, :], shape)          # pos >= 0 table
    angle = abs_pos * jnp.where(nonneg, inv_pos, inv_neg)       # (rows, d)

    lane = jax.lax.broadcasted_iota(jnp.int32, shape, dimension=1)
    even = (lane & 1) == 0
    o_ref[...] = jnp.where(even, jnp.sin(angle), jnp.cos(angle)).astype(o_ref.dtype)


def positional_encoding_angle(x, *, d_model=1024, max_len=45, row_tile=512):
    """x: (nbatch, nsources) float array. Returns (nbatch, nsources, d_model)."""
    nbatch, nsources = x.shape
    n = nbatch * nsources
    xf = x.reshape(n, 1).astype(jnp.float32)

    # Precompute the two sign-dependent 1 / (max_len ** exponent) tables once
    # (hoists the per-element divide out of the kernel entirely).
    j = jnp.arange(d_model, dtype=jnp.int32)
    exp_pos = (2.0 * (j // 2).astype(jnp.float32)) / float(d_model)
    exp_neg = (2.0 * ((d_model - 1 - j) // 2).astype(jnp.float32)) / float(d_model)
    res_f = jnp.float32(max_len)
    inv_denom = jnp.stack(
        [
            1.0 / jnp.power(res_f, exp_neg),   # row 0: pos < 0  -> flipped arange
            1.0 / jnp.power(res_f, exp_pos),   # row 1: pos >= 0 -> arange
        ],
        axis=0,
    )  # (2, d_model) f32

    # Row tile: multiple of 8 (f32 sublane tiling), large enough to amortize
    # per-grid-step overhead (512 rows -> 2 MiB output tile, well inside the
    # default scoped-VMEM limit on v5e/v6e/v7x even when double-buffered), but
    # never larger than needed for small inputs.
    rt = min(int(row_tile), ((n + 7) // 8) * 8)
    rt = max(8, ((rt + 7) // 8) * 8)
    grid = (pl.cdiv(n, rt),)

    out = pl.pallas_call(
        functools.partial(_pe_angle_kernel, res=max_len),
        out_shape=jax.ShapeDtypeStruct((n, d_model), jnp.float32),
        grid_spec=pl.GridSpec(
            grid=grid,
            in_specs=[
                pl.BlockSpec((rt, 1), lambda i: (i, 0)),          # positions column
                pl.BlockSpec((2, d_model), lambda i: (0, 0)),     # shared tables
            ],
            out_specs=pl.BlockSpec((rt, d_model), lambda i: (i, 0)),
        ),
        compiler_params=pltpu.CompilerParams(
            dimension_semantics=("parallel",),
        ),
    )(xf, inv_denom)

    return out.reshape(nbatch, nsources, d_model)


def positional_encoding_angle_ref(x, *, d_model=1024, max_len=45):
    """Pure-JAX reference that transliterates the PyTorch module."""
    nbatch, nsources = x.shape
    pos = jnp.clip(x.reshape(-1).astype(jnp.float32), -float(max_len), float(max_len))
    j = jnp.arange(d_model, dtype=jnp.int32)
    exp_pos = (2.0 * (j // 2).astype(jnp.float32)) / float(d_model)
    exp_neg = (2.0 * ((d_model - 1 - j) // 2).astype(jnp.float32)) / float(d_model)
    denom_pos = jnp.power(jnp.float32(max_len), exp_pos)
    denom_neg = jnp.power(jnp.float32(max_len), exp_neg)
    denom = jnp.where((pos >= 0.0)[:, None], denom_pos[None, :], denom_neg[None, :])
    angle = jnp.abs(pos)[:, None] / denom
    even = (jnp.arange(d_model) % 2) == 0
    enc = jnp.where(even[None, :], jnp.sin(angle), jnp.cos(angle))
    return enc.reshape(nbatch, nsources, d_model)


if __name__ == "__main__":
    key = jax.random.PRNGKey(0)
    # Small shapes consistent with the module: (nbatch=2, nsources=4) positions,
    # d_model=1024, max_len=45. Values beyond +/-45 exercise the clamp.
    x = jax.random.uniform(key, (2, 4), minval=-60.0, maxval=60.0, dtype=jnp.float32)

    out = positional_encoding_angle(x, d_model=1024, max_len=45)
    out = jax.block_until_ready(out)

    ref = positional_encoding_angle_ref(x, d_model=1024, max_len=45)
    assert out.shape == (2, 4, 1024)
    assert jnp.allclose(out, ref, atol=1e-4, rtol=1e-4), "mismatch vs reference"

    print("KERNEL_OK")
</pallas_src>

<mosaic_0001>
module attributes {stable_mosaic.version = 11 : i64} {
  func.func @_pe_angle_kernel(%arg0: i32, %arg1: memref<8x1xf32, #tpu.memory_space<vmem>>, %arg2: memref<2x1024xf32, #tpu.memory_space<vmem>>, %arg3: memref<8x1024xf32, #tpu.memory_space<vmem>>) attributes {dimension_semantics = [#tpu.dimension_semantics<parallel>], iteration_bounds = array<i64: 1>, scalar_prefetch = 0 : i64, scratch_operands = 0 : i64, tpu.core_type = #tpu.core_type<tc>, window_params = [{transform_indices = @transform_0, window_bounds = array<i64: 8, 1>}, {pipeline_mode = #tpu.pipeline_mode<synchronous>, transform_indices = @transform_1, window_bounds = array<i64: 2, 1024>}, {transform_indices = @transform_2, window_bounds = array<i64: 8, 1024>}]} {
    %c0 = arith.constant 0 : index
    %c0_0 = arith.constant 0 : index
    %0 = vector.load %arg1[%c0, %c0_0] : memref<8x1xf32, #tpu.memory_space<vmem>>, vector<8x1xf32>
    %cst = arith.constant -4.500000e+01 : f32
    %cst_1 = arith.constant 4.500000e+01 : f32
    %1 = vector.broadcast %cst : f32 to vector<8x1xf32>
    %2 = arith.maximumf %1, %0 : vector<8x1xf32>
    %3 = vector.broadcast %cst_1 : f32 to vector<8x1xf32>
    %4 = arith.minimumf %3, %2 : vector<8x1xf32>
    %5 = math.absf %4 : vector<8x1xf32>
    %6 = vector.shape_cast %5 : vector<8x1xf32> to vector<8x1xf32>
    %7 = vector.broadcast %6 : vector<8x1xf32> to vector<8x1024xf32>
    %cst_2 = arith.constant 0.000000e+00 : f32
    %8 = vector.broadcast %cst_2 : f32 to vector<8x1xf32>
    %9 = arith.cmpf oge, %4, %8 : vector<8x1xf32>
    %10 = vector.shape_cast %9 : vector<8x1xi1> to vector<8x1xi1>
    %11 = vector.broadcast %10 : vector<8x1xi1> to vector<8x1024xi1>
    %c0_3 = arith.constant 0 : index
    %c0_4 = arith.constant 0 : index
    %12 = vector.load %arg2[%c0_3, %c0_4] : memref<2x1024xf32, #tpu.memory_space<vmem>>, vector<1x1024xf32>
    %13 = vector.shape_cast %12 : vector<1x1024xf32> to vector<1x1024xf32>
    %14 = vector.broadcast %13 : vector<1x1024xf32> to vector<8x1024xf32>
    %c1 = arith.constant 1 : index
    %c0_5 = arith.constant 0 : index
    %15 = vector.load %arg2[%c1, %c0_5] : memref<2x1024xf32, #tpu.memory_space<vmem>>, vector<1x1024xf32>
    %16 = vector.shape_cast %15 : vector<1x1024xf32> to vector<1x1024xf32>
    %17 = vector.broadcast %16 : vector<1x1024xf32> to vector<8x1024xf32>
    %18 = arith.select %11, %17, %14 : vector<8x1024xi1>, vector<8x1024xf32>
    %19 = arith.mulf %7, %18 : vector<8x1024xf32>
    %20 = tpu.iota {dimensions = array<i32: 1>} : vector<8x1024xi32>
    %c1_i32 = arith.constant 1 : i32
    %21 = vector.broadcast %c1_i32 : i32 to vector<8x1024xi32>
    %22 = arith.andi %20, %21 : vector<8x1024xi32>
    %c0_i32 = arith.constant 0 : i32
    %23 = vector.broadcast %c0_i32 : i32 to vector<8x1024xi32>
    %24 = arith.cmpi eq, %22, %23 : vector<8x1024xi32>
    %25 = math.sin %19 : vector<8x1024xf32>
    %26 = math.cos %19 : vector<8x1024xf32>
    %27 = arith.select %24, %25, %26 : vector<8x1024xi1>, vector<8x1024xf32>
    %c0_6 = arith.constant 0 : index
    %c0_7 = arith.constant 0 : index
    %28 = vector.load %arg3[%c0_6, %c0_7] : memref<8x1024xf32, #tpu.memory_space<vmem>>, vector<8x1024xf32>
    tpu.vector_store %arg3[%c0_6, %c0_7], %27 {strides = array<i32>} : memref<8x1024xf32, #tpu.memory_space<vmem>>, vector<8x1024xf32>,
    return
  }
  func.func @transform_0(%arg0: i32) -> (i32, i32) {
    %c0_i32 = arith.constant 0 : i32
    %c0_i32_0 = arith.constant 0 : i32
    return %arg0, %c0_i32 : i32, i32
  }
  func.func @transform_1(%arg0: i32) -> (i32, i32) {
    %c0_i32 = arith.constant 0 : i32
    %c0_i32_0 = arith.constant 0 : i32
    %c0_i32_1 = arith.constant 0 : i32
    return %c0_i32, %c0_i32_0 : i32, i32
  }
  func.func @transform_2(%arg0: i32) -> (i32, i32) {
    %c0_i32 = arith.constant 0 : i32
    %c0_i32_0 = arith.constant 0 : i32
    return %arg0, %c0_i32 : i32, i32
  }
}

</mosaic_0001>

<bundles_post_ra>
// kernel: tpu_custom_call.1
= control target key start
LH: loop header
LB: loop body
LE: loop exit
PB: predicated region body
PF: predicated region fallthrough
CT: control target
= control target key end

     0   :  { %7 = vsyncpa [#allocation3], 0  ;;  %s3198_s0 = inlined_call_operand.vmem [shape: f32[8,1], index: 0, kind: input, shape index: {}]   ;;  %s3199_s1 = inlined_call_operand.hbm [shape: f32[2,1024], index: 1, kind: input, shape index: {}]   ;;  %s3200_s2 = inlined_call_operand.hbm [shape: f32[8,1024], index: 2, kind: output, shape index: {}]  }
   0x1   :  { %8 = vsyncpa [#allocation4], 0  ;;  %s2039_s9 = smov [#allocation2]   ;;  %s1991_s13 = scalar_lea.hbm %s3199_s1, 256 }
   0x2   :  { %s17_s10 = sshll.u32 %s2039_s9, 4  ;;  %p1992_p0 = scmp.ne.s32.totalorder %s3199_s1, %s1991_s13  ;;  %s18_s10 = int_to_ptr.vmem [resolvable:$true] %s17_s10 }
   0x3   :  { %p1995_p1 = scmp.lt.u32.totalorder %s1991_s13, %s3199_s1 }
   0x5   :  { %p1997_p2 = pnand %p1995_p1, %p1992_p0 }
   0x7   :  { %2000 = shalt.err (!%p1997_p2)
}
   0x8   :  { %s2001_s18 = scalar_lea.vmem %s18_s10, 256  ;;  %p2006_p4 = scmp.lt.s32.totalorder %s18_s10, %s18_s10 }
   0x9   :  { %p2002_p3 = scmp.ne.s32.totalorder %s18_s10, %s2001_s18  ;;  %p2007_p5 = scmp.lt.s32.totalorder %s2001_s18, %s2001_s18 }
   0xb   :  { %p2008_p6 = por %p2007_p5, %p2006_p4 }
   0xd   :  { %p2009_p7 = pnand %p2008_p6, %p2002_p3 }
   0xf   :  { %2012 = shalt.err (!%p2009_p7)
}
  0x10   :  { %20 = dma.hbm_to_vmem [thread:$0]  %s3199_s1, 256, %s18_s10, [#allocation3]  }
  0x11   :  { %2035 = dma.done.wait [#allocation3], 256  }
  0x12   :  { %2036 = vsyncadd [#allocation3], 4294967040  ;;  %v2040_v0 = vmov 0   ;;  %v24_v1 = vld [vmem:[%s3198_s0] sm:$0xff]  ;;  %v41_v5 = vlaneseq  ;;  %v3219_v59 = vmov 683565275  }
  0x13   :  { %1958 = vset.pattern.permute.xlu0 %v2040_v0  ;;  %v1852_v2 = vclamps-f32 %v24_v1, 45.0  ;;  %v2083_v9 = vld [vmem:[#allocation2] ss:$2 sm:$0xff]  ;;  %v2086_v11 = vld [vmem:[#allocation2 + $0x1] ss:$2 sm:$0xff]  ;;  %s2047_s0 = smov [#allocation5]  }
  0x14   :  { %v2079_v6 = vshrl.u32 %v41_v5, 7  ;;  %v2042_v63 = vmov 2475754826   ;;  %v3223_v1 = vmov 2131351028   ;;  %s1843_s1 = sshll.u32 %s2047_s0, 4  ;;  %s1844_s1 = int_to_ptr.vmem [resolvable:$true] %s1843_s1 }
  0x15   :  { %vm33_vm0 = vcmp.ge.f32.partialorder %v1852_v2, 0.0  ;;  %v27_v4 = vand.u32 2147483647, %v1852_v2  ;;  %s2013_s23 = scalar_lea.vmem %s1844_s1, 1024  ;;  %p2018_p9 = scmp.lt.s32.totalorder %s1844_s1, %s1844_s1 }
  0x16   :  { %v34_v3 = vsel %vm33_vm0, 1, %v2040_v0  ;;  %v43_v7 = vsub.s32 0, %v2079_v6  ;;  %v47_v8 = vsub.s32 1, %v2079_v6  ;;  %v51_v10 = vsub.s32 2, %v2079_v6  ;;  %p2014_p8 = scmp.ne.s32.totalorder %s1844_s1, %s2013_s23  ;;  %p2019_p10 = scmp.lt.s32.totalorder %s2013_s23, %s2013_s23 }
  0x17   :  { %36 = vperm.xlu0 %1958, %v34_v3   ;;  %v55_v28 = vsub.s32 3, %v2079_v6  ;;  %v59_v36 = vsub.s32 4, %v2079_v6  ;;  %v63_v39 = vsub.s32 5, %v2079_v6  ;;  %v67_v42 = vsub.s32 6, %v2079_v6 }
  0x18   :  { %v44_v13 = vrot.slane %v2083_v9, %v43_v7  ;;  %v48_v14 = vrot.slane %v2083_v9, %v47_v8  ;;  %v87_v15 = vrot.slane %v2086_v11, %v43_v7  ;;  %v91_v16 = vrot.slane %v2086_v11, %v47_v8  ;;  %p2020_p11 = por %p2019_p10, %p2018_p9 }
  0x19   :  { %v52_v17 = vrot.slane %v2083_v9, %v51_v10  ;;  %v95_v18 = vrot.slane %v2086_v11, %v51_v10  ;;  %v56_v38 = vrot.slane %v2083_v9, %v55_v28  ;;  %v99_v43 = vrot.slane %v2086_v11, %v55_v28 }
  0x1a   :  { %v71_v49 = vsub.s32 7, %v2079_v6  ;;  %v2044_v3 = vmov 2102212464   ;;  %v3211_v7 = vmov 920167782   ;;  %p2021_p12 = pnand %p2020_p11, %p2014_p8 }
  0x1b   :  { %30 = vperm.xlu0 %1958, %v27_v4  }
  0x96   :  { %v2088_v12 = vpop.permute.xlu0 %36 }
  0x97   :  { %vm38_vm1 = vcmp.eq.s32.totalorder %v2088_v12, 1 }
  0x98   :  { %v124_v20 = vsel %vm38_vm1, %v87_v15, %v44_v13  ;;  %v125_v21 = vsel %vm38_vm1, %v91_v16, %v48_v14  ;;  %v126_v22 = vsel %vm38_vm1, %v95_v18, %v52_v17  ;;  %v2132_v54 = vsel %vm38_vm1, %v99_v43, %v56_v38 }
  0x99   :  { %v3209_v17 = vmov 1326507024  }
  0x9a   :  { %v2097_v19 = vpop.permute.xlu0 %30 }
  0x9b   :  { %v2106_v23 = vmul.f32 %v124_v20, %v2097_v19  ;;  %v2109_v24 = vmul.f32 %v125_v21, %v2097_v19  ;;  %v2112_v25 = vmul.f32 %v126_v22, %v2097_v19 }
  0x9d   :  { %v165_v26 = vand.u32 2147483647, %v2106_v23  ;;  %v168_v27 = vand.u32 2139095040, %v2106_v23  ;;  %v269_v29 = vand.u32 2147483647, %v2109_v24  ;;  %v272_v30 = vand.u32 2139095040, %v2109_v24 }
  0x9e   :  { %v376_v35 = vand.u32 2139095040, %v2112_v25 }
  0x9f   :  { %v169_v31 = vshrl.u32 %v168_v27, 23  ;;  %v172_v32 = vand.u32 8388607, %v165_v26  ;;  %v273_v33 = vshrl.u32 %v272_v30, 23  ;;  %v276_v34 = vand.u32 8388607, %v269_v29 }
  0xa0   :  { %v377_v41 = vshrl.u32 %v376_v35, 23 }
  0xa1   :  { %v1853_v37 = vadd.s32 4294967169, %v169_v31  ;;  %v1857_v40 = vadd.s32 4294967169, %v273_v33  ;;  %v173_v45 = vor.u32 8388608, %v172_v32  ;;  %v277_v46 = vor.u32 8388608, %v276_v34 }
  0xa2   :  { %v1861_v48 = vadd.s32 4294967169, %v377_v41 }
  0xa3   :  { %v175_v44 = vadd.s32 1, %v1853_v37  ;;  %v279_v47 = vadd.s32 1, %v1857_v40  ;;  %v2134_v55 = vshll.u32 %v173_v45, 8  ;;  %v2136_v56 = vshll.u32 %v277_v46, 8 }
  0xa4   :  { %v2138_v57 = vadd.s32 1, %v1861_v48 }
  0xa5   :  { %vm176_vm2 = vcmp.gt.s32.totalorder %v175_v44, 0  ;;  %vm280_vm3 = vcmp.gt.s32.totalorder %v279_v47, 0 }
  0xa6   :  { %v177_v50 = vsel %vm176_vm2, %v175_v44, 0  ;;  %v281_v53 = vsel %vm280_vm3, %v279_v47, 0  ;;  %vm384_vm8 = vcmp.gt.s32.totalorder %v2138_v57, 0 }
  0xa7   :  { %v178_v51 = vshrl.u32 %v177_v50, 5  ;;  %v179_v52 = vand.u32 31, %v177_v50  ;;  %v2141_v61 = vshrl.u32 %v281_v53, 5  ;;  %v283_v62 = vand.u32 31, %v281_v53 }
  0xa9   :  { %v180_v58 = vsub.s32 32, %v179_v52  ;;  %v182_v60 = vshll.u32 %v3219_v59, %v179_v52  ;;  %v185_v0 = vshll.u32 %v2042_v63, %v179_v52  ;;  %v188_v2 = vshll.u32 %v3223_v1, %v179_v52 }
  0xaa   :  { %v191_v4 = vshll.u32 %v2044_v3, %v179_v52  ;;  %v194_v8 = vshll.u32 %v3211_v7, %v179_v52  ;;  %vm197_vm4 = vcmp.lt.s32.totalorder %v178_v51, 1  ;;  %vm198_vm5 = vcmp.lt.s32.totalorder %v178_v51, 2 }
  0xab   :  { %v183_v10 = vshrl.u32 %v2042_v63, %v180_v58  ;;  %v186_v13 = vshrl.u32 %v3223_v1, %v180_v58  ;;  %v189_v14 = vshrl.u32 %v2044_v3, %v180_v58  ;;  %v181_v15 = vshrl.u32 %v3219_v59, %v180_v58 }
  0xac   :  { %v192_v16 = vshrl.u32 %v3211_v7, %v180_v58  ;;  %v195_v18 = vshrl.u32 %v3209_v17, %v180_v58  ;;  %v284_v27 = vsub.s32 32, %v283_v62  ;;  %vm199_vm6 = vcmp.lt.s32.totalorder %v178_v51, 3 }
  0xad   :  { %v184_v20 = vor.u32 %v183_v10, %v182_v60  ;;  %v187_v21 = vor.u32 %v186_v13, %v185_v0  ;;  %v190_v22 = vor.u32 %v189_v14, %v188_v2  ;;  %vm200_vm7 = vcmp.lt.s32.totalorder %v178_v51, 4 }
  0xae   :  { %v193_v28 = vor.u32 %v192_v16, %v191_v4  ;;  %v196_v30 = vor.u32 %v195_v18, %v194_v8  ;;  %v286_v40 = vshll.u32 %v3219_v59, %v283_v62  ;;  %v287_v44 = vshrl.u32 %v2042_v63, %v284_v27 }
  0xaf   :  { %v201_v31 = vsel %vm197_vm4, %v181_v15, %v184_v20  ;;  %v202_v32 = vsel %vm200_vm7, %v190_v22, 2102212464  ;;  %v205_v33 = vsel %vm197_vm4, %v184_v20, %v187_v21  ;;  %v209_v34 = vsel %vm197_vm4, %v187_v21, %v190_v22 }
  0xb0   :  { %v203_v35 = vsel %vm199_vm6, %v187_v21, %v202_v32  ;;  %v206_v37 = vsel %vm200_vm7, %v193_v28, 920167782  ;;  %v210_v38 = vsel %vm200_vm7, %v196_v30, 1326507024  ;;  %v289_v45 = vshll.u32 %v2042_v63, %v283_v62 }
  0xb1   :  { %v207_v41 = vsel %vm199_vm6, %v190_v22, %v206_v37  ;;  %v211_v43 = vsel %vm199_vm6, %v193_v28, %v210_v38  ;;  %v204_v46 = vsel %vm198_vm5, %v201_v31, %v203_v35  ;;  %v290_v50 = vshrl.u32 %v3223_v1, %v284_v27 }
  0xb2   :  { %v208_v47 = vsel %vm198_vm5, %v205_v33, %v207_v41  ;;  %v212_v48 = vsel %vm198_vm5, %v209_v34, %v211_v43  ;;  %v288_v0 = vor.u32 %v287_v44, %v286_v40  ;;  %v292_v4 = vshll.u32 %v3223_v1, %v283_v62 }
  0xb3   :  { %v2165_v52 = vmul.u32.u64.low %v2134_v55, %v212_v48  ;;  %v2166_v53 = vmul.u32.u64.high %v2134_v55, %v212_v48, %v2165_v52  ;;  %v2169_v58 = vmul.u32.u64.low %v2134_v55, %v208_v47  ;;  %v2170_v60 = vmul.u32.u64.high %v2134_v55, %v208_v47, %v2169_v58 }
  0xb4   :  { %v291_v2 = vor.u32 %v290_v50, %v289_v45  ;;  %v293_v8 = vshrl.u32 %v2044_v3, %v284_v27  ;;  %v285_v51 = vshrl.u32 %v3219_v59, %v284_v27  ;;  %v295_v10 = vshll.u32 %v2044_v3, %v283_v62 }
  0xb5   :  { %v296_v13 = vshrl.u32 %v3211_v7, %v284_v27  ;;  %v299_v14 = vshrl.u32 %v3209_v17, %v284_v27  ;;  %v220_v15 = vmul.u32 %v2134_v55, %v204_v46  ;;  %v298_v18 = vshll.u32 %v3211_v7, %v283_v62 }
  0xb6   :  { %v294_v16 = vor.u32 %v293_v8, %v292_v4  ;;  %vm301_vm9 = vcmp.lt.s32.totalorder %v2141_v61, 1  ;;  %vm222_vm10 = vc.u32 %v2166_v53, %v2169_v58  ;;  %v223_v20 = vadd.s32 1, %v2170_v60 }
  0xb7   :  { %v297_v21 = vor.u32 %v296_v13, %v295_v10  ;;  %vm302_vm11 = vcmp.lt.s32.totalorder %v2141_v61, 2  ;;  %v300_v22 = vor.u32 %v299_v14, %v298_v18  ;;  %vm303_vm12 = vcmp.lt.s32.totalorder %v2141_v61, 3 }
  0xb8   :  { %vm304_vm13 = vcmp.lt.s32.totalorder %v2141_v61, 4  ;;  %v309_v27 = vsel %vm301_vm9, %v288_v0, %v291_v2  ;;  %v224_v55 = vsel %vm222_vm10, %v223_v20, %v2170_v60  ;;  %v313_v30 = vsel %vm301_vm9, %v291_v2, %v294_v16 }
  0xb9   :  { %v306_v28 = vsel %vm304_vm13, %v294_v16, 2102212464  ;;  %v310_v62 = vsel %vm304_vm13, %v297_v21, 920167782  ;;  %v225_v31 = vadd.s32 %v224_v55, %v220_v15  ;;  %v305_v32 = vsel %vm301_vm9, %v285_v51, %v288_v0 }
  0xba   :  { %v311_v33 = vsel %vm303_vm12, %v294_v16, %v310_v62  ;;  %v314_v34 = vsel %vm304_vm13, %v300_v22, 1326507024  ;;  %v307_v35 = vsel %vm303_vm12, %v291_v2, %v306_v28  ;;  %v385_v40 = vsel %vm384_vm8, %v2138_v57, 0 }
  0xbb   :  { %v312_v37 = vsel %vm302_vm11, %v309_v27, %v311_v33  ;;  %v315_v38 = vsel %vm303_vm12, %v297_v21, %v314_v34  ;;  %v226_v41 = vadd.s32 536870912, %v225_v31  ;;  %v2204_v46 = vrot.slane %v2083_v9, %v59_v36 }
  0xbc   :  { %v316_v43 = vsel %vm302_vm11, %v313_v30, %v315_v38  ;;  %v2197_v44 = vmul.u32.u64.low %v2136_v56, %v312_v37  ;;  %v2198_v45 = vmul.u32.u64.high %v2136_v56, %v312_v37, %v2197_v44  ;;  %v2208_v47 = vmul.f32 %v2132_v54, %v2097_v19 }
  0xbd   :  { %v2211_v57 = vmul.u32.u64.low %v2136_v56, %v316_v43  ;;  %v2212_v48 = vmul.u32.u64.high %v2136_v56, %v316_v43, %v2211_v57  ;;  %v2217_v50 = vrot.slane %v2083_v9, %v63_v39  ;;  %v2219_v52 = vshrl.u32 %v226_v41, 30 }
  0xbe   :  { %v308_v60 = vsel %vm302_vm11, %v305_v32, %v307_v35  ;;  %v387_v0 = vand.u32 31, %v385_v40  ;;  %v2226_v54 = vrot.slane %v2083_v9, %v67_v42  ;;  %v2231_v2 = vrot.slane %v2083_v9, %v71_v49 }
  0xbf   :  { %v2236_v4 = vrot.slane %v2086_v11, %v59_v36  ;;  %v2239_v8 = vand.u32 127, %v41_v5  ;;  %v228_v61 = vshll.u32 %v2219_v52, 30  ;;  %v327_v51 = vadd.s32 1, %v2198_v45 }
  0xc0   :  { %v373_v10 = vand.u32 2147483647, %v2112_v25  ;;  %v388_v13 = vsub.s32 32, %v387_v0  ;;  %v2247_v9 = vrot.slane %v2086_v11, %v63_v39  ;;  %v324_v14 = vmul.u32 %v2136_v56, %v308_v60 }
  0xc1   :  { %vm326_vm14 = vc.u32 %v2212_v48, %v2197_v44  ;;  %v480_v5 = vand.u32 2139095040, %v2208_v47  ;;  %v2256_v36 = vrot.slane %v2086_v11, %v67_v42  ;;  %v2261_v15 = vrot.slane %v2086_v11, %v71_v49 }
  0xc2   :  { %v2263_v16 = vsub.s32 %v225_v31, %v228_v61  ;;  %v328_v39 = vsel %vm326_vm14, %v327_v51, %v2198_v45  ;;  %v2267_v56 = vadd.s32 128, %v2239_v8  ;;  %v2270_v18 = vadd.s32 256, %v2239_v8 }
  0xc3   :  { %v2273_v20 = vadd.s32 384, %v2239_v8  ;;  %v329_v42 = vadd.s32 %v328_v39, %v324_v14  ;;  %v380_v6 = vand.u32 8388607, %v373_v10  ;;  %v391_v11 = vshrl.u32 %v2042_v63, %v388_v13 }
  0xc4   :  { %3228 = vst [vmem:[#allocation8_spill] sm:$0xff] %v2270_v18  ;;  %v231_v21 = vsub.s32 0, %v2263_v16  ;;  %v394_v49 = vshrl.u32 %v3223_v1, %v388_v13  ;;  %v2280_v27 = vshrl.u32 %v385_v40, 5  ;;  %v397_v55 = vshrl.u32 %v2044_v3, %v388_v13 }
  0xc5   :  { %3229 = vst [vmem:[#allocation9_spill] sm:$0xff] %v2273_v20  ;;  %v330_v22 = vadd.s32 536870912, %v329_v42  ;;  %v481_v28 = vshrl.u32 %v480_v5, 23  ;;  %v390_v30 = vshll.u32 %v3219_v59, %v387_v0  ;;  %v393_v31 = vshll.u32 %v2042_v63, %v387_v0 }
  0xc6   :  { %v1854_v62 = vmin.u32 %v231_v21, %v2263_v16  ;;  %v400_v32 = vshrl.u32 %v3211_v7, %v388_v13  ;;  %v396_v34 = vshll.u32 %v3223_v1, %v387_v0  ;;  %v399_v35 = vshll.u32 %v2044_v3, %v387_v0 }
  0xc7   :  { %v2287_v33 = vshrl.u32 %v330_v22, 30  ;;  %v403_v37 = vshrl.u32 %v3209_v17, %v388_v13  ;;  %v392_v40 = vor.u32 %v391_v11, %v390_v30  ;;  %v395_v41 = vor.u32 %v394_v49, %v393_v31 }
  0xc8   :  { %v233_v38 = vclz %v1854_v62  ;;  %v402_v43 = vshll.u32 %v3211_v7, %v387_v0  ;;  %v2294_v45 = vadd.s32 512, %v2239_v8  ;;  %v398_v60 = vor.u32 %v397_v55, %v396_v34 }
  0xc9   :  { %v332_v57 = vshll.u32 %v2287_v33, 30  ;;  %v401_v61 = vor.u32 %v400_v32, %v399_v35  ;;  %v381_v14 = vor.u32 8388608, %v380_v6  ;;  %vm408_vm15 = vcmp.lt.s32.totalorder %v2280_v27, 4 }
  0xca   :  { %3230 = vst [vmem:[#allocation10_spill] sm:$0xff] %v2294_v45  ;;  %v1855_v51 = vadd.s32 4294967294, %v233_v38  ;;  %v404_v5 = vor.u32 %v403_v37, %v402_v43  ;;  %v2299_v39 = vadd.s32 640, %v2239_v8  ;;  %vm405_vm0 = vcmp.lt.s32.totalorder %v2280_v27, 1 }
  0xcb   :  { %v2301_v21 = vsub.s32 %v329_v42, %v332_v57  ;;  %v414_v0 = vsel %vm408_vm15, %v401_v61, 920167782  ;;  %vm407_vm3 = vcmp.lt.s32.totalorder %v2280_v27, 3  ;;  %v413_v11 = vsel %vm405_vm0, %v392_v40, %v395_v41 }
  0xcc   :  { %3231 = vst [vmem:[#allocation11_spill] sm:$0xff] %v2299_v39  ;;  %vm1856_vm2 = vcmp.lt.s32.totalorder %v1855_v51, 0  ;;  %v1865_v6 = vadd.s32 4294967169, %v481_v28  ;;  %v415_v55 = vsel %vm407_vm3, %v398_v60, %v414_v0  ;;  %v417_v42 = vsel %vm405_vm0, %v395_v41, %v398_v60 }
  0xcd   :  { %v236_v49 = vsel %vm1856_vm2, 0, %v1855_v51  ;;  %v335_v22 = vsub.s32 0, %v2301_v21  ;;  %v2315_v62 = vadd.s32 768, %v2239_v8  ;;  %vm406_vm4 = vcmp.lt.s32.totalorder %v2280_v27, 2 }
  0xce   :  { %v418_v30 = vsel %vm408_vm15, %v404_v5, 1326507024  ;;  %v421_v31 = vshll.u32 %v381_v14, 8  ;;  %v389_v32 = vshrl.u32 %v3219_v59, %v388_v13  ;;  %v410_v34 = vsel %vm408_vm15, %v398_v60, 2102212464 }
  0xcf   :  { %3232 = vst [vmem:[#allocation12_spill] sm:$0xff] %v2315_v62  ;;  %v1858_v28 = vmin.u32 %v335_v22, %v2301_v21  ;;  %v419_v35 = vsel %vm407_vm3, %v401_v61, %v418_v30  ;;  %v241_v37 = vsub.s32 4294967266, %v236_v49  ;;  %v416_v38 = vsel %vm406_vm4, %v413_v11, %v415_v55 }
  0xd0   :  { %v420_v43 = vsel %vm406_vm4, %v417_v42, %v419_v35  ;;  %v487_v57 = vadd.s32 1, %v1865_v6  ;;  %v477_v13 = vand.u32 2147483647, %v2208_v47  ;;  %v409_v60 = vsel %vm405_vm0, %v389_v32, %v392_v40 }
  0xd1   :  { %v337_v5 = vclz %v1858_v28  ;;  %v411_v61 = vsel %vm407_vm3, %v395_v41, %v410_v34  ;;  %v2337_v0 = vmul.u32.u64.low %v421_v31, %v420_v43  ;;  %v2338_v22 = vmul.u32.u64.high %v421_v31, %v420_v43, %v2337_v0 }
  0xd2   :  { %v2340_v55 = vmul.u32.u64.low %v421_v31, %v416_v38  ;;  %v2341_v42 = vmul.u32.u64.high %v421_v31, %v416_v38, %v2340_v55  ;;  %vm488_vm5 = vcmp.gt.s32.totalorder %v487_v57, 0  ;;  %v237_v30 = vsub.s32 32, %v236_v49 }
  0xd3   :  { %v1859_v11 = vadd.s32 4294967294, %v337_v5  ;;  %v242_v28 = vadd.s32 127, %v241_v37  ;;  %v489_v35 = vsel %vm488_vm5, %v487_v57, 0  ;;  %v412_v40 = vsel %vm406_vm4, %v409_v60, %v411_v61 }
  0xd4   :  { %v491_v41 = vand.u32 31, %v489_v35  ;;  %v221_v34 = vadd.s32 %v2169_v58, %v2166_v53  ;;  %vm430_vm7 = vc.u32 %v2338_v22, %v2340_v55  ;;  %v128_v37 = vsel %vm38_vm1, %v2236_v4, %v2204_v46 }
  0xd5   :  { %vm1860_vm6 = vcmp.lt.s32.totalorder %v1859_v11, 0  ;;  %v431_v27 = vadd.s32 1, %v2341_v42  ;;  %v484_v57 = vand.u32 8388607, %v477_v13  ;;  %v243_v60 = vshll.u32 %v242_v28, 23 }
  0xd6   :  { %v2351_v38 = vsel %vm1860_vm6, 0, %v1859_v11  ;;  %v239_v5 = vshrl.u32 %v221_v34, %v237_v30  ;;  %v428_v53 = vmul.u32 %v421_v31, %v412_v40  ;;  %v492_v58 = vsub.s32 32, %v491_v41 }
  0xd7   :  { %v129_v61 = vsel %vm38_vm1, %v2247_v9, %v2217_v50  ;;  %v2371_v46 = vsel %vm38_vm1, %v2256_v36, %v2226_v54  ;;  %v345_v4 = vsub.s32 4294967266, %v2351_v38  ;;  %v432_v0 = vsel %vm430_vm7, %v431_v27, %v2341_v42 }
  0xd8   :  { %v2379_v31 = vsel %vm38_vm1, %v2261_v15, %v2231_v2  ;;  %v2382_v11 = vmul.f32 %v128_v37, %v2097_v19  ;;  %v238_v50 = vshll.u32 %v2263_v16, %v236_v49  ;;  %v433_v9 = vadd.s32 %v432_v0, %v428_v53 }
  0xd9   :  { %v2386_v30 = vmul.f32 %v129_v61, %v2097_v19  ;;  %v485_v54 = vor.u32 8388608, %v484_v57  ;;  %v495_v36 = vshrl.u32 %v2042_v63, %v492_v58  ;;  %v498_v42 = vshrl.u32 %v3223_v1, %v492_v58 }
  0xda   :  { %v240_v28 = vor.u32 %v239_v5, %v238_v50  ;;  %v244_v40 = vor.u32 4788187, %v243_v60  ;;  %v434_v34 = vadd.s32 536870912, %v433_v9  ;;  %v2390_v12 = vshrl.u32 %v489_v35, 5 }
  0xdb   :  { %v346_v2 = vadd.s32 127, %v345_v4  ;;  %v494_v15 = vshll.u32 %v3219_v59, %v491_v41  ;;  %v497_v37 = vshll.u32 %v2042_v63, %v491_v41  ;;  %v501_v16 = vshrl.u32 %v2044_v3, %v492_v58 }
  0xdc   :  { %v341_v49 = vsub.s32 32, %v2351_v38  ;;  %v2396_v27 = vshrl.u32 %v434_v34, 30  ;;  %v503_v57 = vshll.u32 %v2044_v3, %v491_v41  ;;  %v504_v53 = vshrl.u32 %v3211_v7, %v492_v58 }
  0xdd   :  { %v496_v5 = vor.u32 %v495_v36, %v494_v15  ;;  %v499_v60 = vor.u32 %v498_v42, %v497_v37  ;;  %v500_v35 = vshll.u32 %v3223_v1, %v491_v41  ;;  %v507_v61 = vshrl.u32 %v3209_v17, %v492_v58 }
  0xde   :  { %v251_v4 = vsub.s32 4, %v2219_v52  ;;  %v325_v0 = vadd.s32 %v2197_v44, %v2212_v48  ;;  %v436_v50 = vshll.u32 %v2396_v27, 30  ;;  %v505_v43 = vor.u32 %v504_v53, %v503_v57 }
  0xdf   :  { %v247_v34 = vcvt.s32.f32 %v240_v28  ;;  %v347_v32 = vshll.u32 %v346_v2, 23  ;;  %v502_v14 = vor.u32 %v501_v16, %v500_v35  ;;  %v506_v6 = vshll.u32 %v3211_v7, %v491_v41 }
  0xe0   :  { %vm167_vm1 = vcmp.lt.s32.totalorder %v2106_v23, 0  ;;  %v343_v36 = vshrl.u32 %v325_v0, %v341_v49  ;;  %v2408_v42 = vsub.s32 %v433_v9, %v436_v50  ;;  %vm509_vm8 = vcmp.lt.s32.totalorder %v2390_v12, 1 }
  0xe1   :  { %v525_v15 = vshll.u32 %v485_v54, 8  ;;  %v245_v37 = vand.u32 2147483647, %v244_v40  ;;  %v508_v51 = vor.u32 %v507_v61, %v506_v6  ;;  %vm512_vm9 = vcmp.lt.s32.totalorder %v2390_v12, 4 }
  0xe2   :  { %v517_v44 = vsel %vm509_vm8, %v496_v5, %v499_v60  ;;  %v342_v48 = vshll.u32 %v2301_v21, %v2351_v38  ;;  %v439_v41 = vsub.s32 0, %v2408_v42  ;;  %vm511_vm10 = vcmp.lt.s32.totalorder %v2390_v12, 3 }
  0xe3   :  { %v518_v28 = vsel %vm512_vm9, %v505_v43, 920167782  ;;  %v348_v9 = vor.u32 4788187, %v347_v32  ;;  %v493_v2 = vshrl.u32 %v3219_v59, %v492_v58  ;;  %vm510_vm11 = vcmp.lt.s32.totalorder %v2390_v12, 2 }
  0xe4   :  { %v519_v6 = vsel %vm511_vm10, %v502_v14, %v518_v28  ;;  %v344_v54 = vor.u32 %v343_v36, %v342_v48  ;;  %v1862_v40 = vmin.u32 %v439_v41, %v2408_v42  ;;  %v514_v16 = vsel %vm512_vm9, %v502_v14, 2102212464 }
  0xe5   :  { %v520_v21 = vsel %vm510_vm11, %v517_v44, %v519_v6  ;;  %v521_v38 = vsel %vm509_vm8, %v499_v60, %v502_v14  ;;  %v522_v49 = vsel %vm512_vm9, %v508_v51, 1326507024  ;;  %v248_v58 = vmul.f32 %v247_v34, %v245_v37 }
  0xe6   :  { %v2427_v57 = vmul.u32.u64.low %v525_v15, %v520_v21  ;;  %v2428_v32 = vmul.u32.u64.high %v525_v15, %v520_v21, %v2427_v57  ;;  %vm271_vm12 = vcmp.lt.s32.totalorder %v2109_v24, 0  ;;  %v355_v53 = vsub.s32 4, %v2287_v33 }
  0xe7   :  { %v441_v35 = vclz %v1862_v40  ;;  %v349_v61 = vand.u32 2147483647, %v348_v9  ;;  %v513_v0 = vsel %vm509_vm8, %v493_v2, %v496_v5  ;;  %v515_v50 = vsel %vm511_vm10, %v499_v60, %v514_v16 }
  0xe8   :  { %v523_v51 = vsel %vm511_vm10, %v505_v43, %v522_v49  ;;  %vm2441_vm13 = vcmp.le.f32.partialorder %v165_v26, 0.7853982  ;;  %vm375_vm14 = vcmp.lt.s32.totalorder %v2112_v25, 0  ;;  %v252_v5 = vsel %vm167_vm1, %v251_v4, %v2219_v52 }
  0xe9   :  { %v1863_v34 = vadd.s32 4294967294, %v441_v35  ;;  %v524_v36 = vsel %vm510_vm11, %v521_v38, %v523_v51  ;;  %v351_v60 = vcvt.s32.f32 %v344_v54  ;;  %v356_v26 = vsel %vm271_vm12, %v355_v53, %v2287_v33 }
  0xea   :  { %v2451_v37 = vmul.u32.u64.low %v525_v15, %v524_v36  ;;  %v2452_v44 = vmul.u32.u64.high %v525_v15, %v524_v36, %v2451_v37  ;;  %v516_v43 = vsel %vm510_vm11, %v513_v0, %v515_v50  ;;  %v535_v48 = vadd.s32 1, %v2428_v32 }
  0xeb   :  { %vm1864_vm15 = vcmp.lt.s32.totalorder %v1863_v34, 0  ;;  %v249_v41 = vxor.u32 2147483648, %v248_v58  ;;  %v352_v28 = vmul.f32 %v351_v60, %v349_v61  ;;  %v584_v2 = vand.u32 2139095040, %v2382_v11 }
  0xec   :  { %v444_v9 = vsel %vm1864_vm15, 0, %v1863_v34  ;;  %v2463_v52 = vsel %vm2441_vm13, 0, %v252_v5  ;;  %vm2467_vm0 = vcmp.le.f32.partialorder %v269_v29, 0.7853982  ;;  %v459_v12 = vsub.s32 4, %v2396_v27 }
  0xed   :  { %v449_v33 = vsub.s32 4294967266, %v444_v9  ;;  %v532_v6 = vmul.u32 %v525_v15, %v516_v43  ;;  %vm534_vm2 = vc.u32 %v2452_v44, %v2427_v57  ;;  %v581_v54 = vand.u32 2147483647, %v2382_v11 }
  0xee   :  { %v585_v40 = vshrl.u32 %v584_v2, 23  ;;  %v2477_v16 = vsel %vm2467_vm0, 0, %v356_v26  ;;  %v445_v21 = vsub.s32 32, %v444_v9  ;;  %v536_v29 = vsel %vm534_vm2, %v535_v48, %v2428_v32 }
  0xef   :  { %v450_v38 = vadd.s32 127, %v449_v33  ;;  %v250_v49 = vsel %vm167_vm1, %v249_v41, %v248_v58  ;;  %v353_v53 = vxor.u32 2147483648, %v352_v28  ;;  %v537_v35 = vadd.s32 %v536_v29, %v532_v6 }
  0xf0   :  { %v1869_v15 = vadd.s32 4294967169, %v585_v40  ;;  %v2484_v61 = vmul.f32 %v2371_v46, %v2097_v19  ;;  %v429_v0 = vadd.s32 %v2340_v55, %v2338_v22  ;;  %v460_v51 = vsel %vm375_vm14, %v459_v12, %v2396_v27 }
  0xf1   :  { %v451_v50 = vshll.u32 %v450_v38, 23  ;;  %v258_v32 = vadd.s32 3, %v2463_v52  ;;  %v538_v34 = vadd.s32 536870912, %v537_v35  ;;  %v588_v58 = vand.u32 8388607, %v581_v54 }
  0xf2   :  { %v591_v36 = vadd.s32 1, %v1869_v15  ;;  %v253_v46 = vsel %vm2441_vm13, %v2106_v23, %v250_v49  ;;  %v362_v5 = vadd.s32 3, %v2477_v16  ;;  %vm2500_vm3 = vcmp.le.f32.partialorder %v373_v10, 0.7853982 }
  0xf3   :  { %v447_v55 = vshrl.u32 %v429_v0, %v445_v21  ;;  %v354_v27 = vsel %vm271_vm12, %v353_v53, %v352_v28  ;;  %v2508_v60 = vsel %vm2500_vm3, 0, %v460_v51  ;;  %v2510_v37 = vshrl.u32 %v538_v34, 30 }
  0xf4   :  { %vm592_vm4 = vcmp.gt.s32.totalorder %v591_v36, 0  ;;  %v446_v14 = vshll.u32 %v2408_v42, %v444_v9  ;;  %v452_v26 = vor.u32 4788187, %v451_v50  ;;  %v688_v10 = vand.u32 2139095040, %v2386_v30 }
  0xf5   :  { %v593_v43 = vsel %vm592_vm4, %v591_v36, 0  ;;  %v2516_v48 = vmul.f32 %v2379_v31, %v2097_v19  ;;  %v2518_v41 = vand.u32 3, %v258_v32  ;;  %v540_v28 = vshll.u32 %v2510_v37, 30 }
  0xf6   :  { %v589_v2 = vor.u32 8388608, %v588_v58  ;;  %1959 = vcosq.f32 %v253_v46  ;;  %v2524_v33 = vsel %vm2467_vm0, %v2109_v24, %v354_v27  ;;  %v448_v42 = vor.u32 %v447_v55, %v446_v14 }
  0xf7   :  { %v595_v9 = vand.u32 31, %v593_v43  ;;  %1961 = vsinq.f32 %v253_v46  ;;  %v2526_v12 = vand.u32 3, %v362_v5  ;;  %v2529_v6 = vadd.s32 3, %v2508_v60 }
  0xf8   :  { %v2531_v19 = vsub.s32 %v537_v35, %v540_v28  ;;  %v453_v31 = vand.u32 2147483647, %v452_v26  ;;  %v2533_v40 = vshrl.u32 %v593_v43, 5  ;;  %v689_v38 = vshrl.u32 %v688_v10, 23 }
  0xf9   :  { %v596_v21 = vsub.s32 32, %v595_v9  ;;  %1963 = vcosq.f32 %v2524_v33  ;;  %v533_v4 = vadd.s32 %v2427_v57, %v2452_v44  ;;  %v2539_v49 = vshll.u32 %v589_v2, 8 }
  0xfa   :  { %v543_v29 = vsub.s32 0, %v2531_v19  ;;  %v455_v53 = vcvt.s32.f32 %v448_v42  ;;  %v3201_v0 = vand.u32 2147483647, %v2386_v30  ;;  %v598_v51 = vshll.u32 %v3219_v59, %v595_v9 }
  0xfb   :  { %v599_v15 = vshrl.u32 %v2042_v63, %v596_v21  ;;  %v602_v35 = vshrl.u32 %v3223_v1, %v596_v21  ;;  %v601_v32 = vshll.u32 %v2042_v63, %v595_v9  ;;  %v605_v34 = vshrl.u32 %v2044_v3, %v596_v21 }
  0xfc   :  { %v1866_v50 = vmin.u32 %v543_v29, %v2531_v19  ;;  %v456_v57 = vmul.f32 %v455_v53, %v453_v31  ;;  %v604_v44 = vshll.u32 %v3223_v1, %v595_v9  ;;  %vm613_vm5 = vcmp.lt.s32.totalorder %v2533_v40, 1 }
  0xfd   :  { %v1873_v58 = vadd.s32 4294967169, %v689_v38  ;;  %v600_v46 = vor.u32 %v599_v15, %v598_v51  ;;  %v603_v5 = vor.u32 %v602_v35, %v601_v32  ;;  %vm614_vm6 = vcmp.lt.s32.totalorder %v2533_v40, 2 }
  0xfe   :  { %v545_v36 = vclz %v1866_v50  ;;  %v597_v55 = vshrl.u32 %v3219_v59, %v596_v21  ;;  %v606_v27 = vor.u32 %v605_v34, %v604_v44  ;;  %v607_v14 = vshll.u32 %v2044_v3, %v595_v9 }
  0xff   :  { %v608_v26 = vshrl.u32 %v3211_v7, %v596_v21  ;;  %v610_v10 = vshll.u32 %v3211_v7, %v595_v9  ;;  %v611_v28 = vshrl.u32 %v3209_v17, %v596_v21  ;;  %vm616_vm7 = vcmp.lt.s32.totalorder %v2533_v40, 4 }
 0x100   :  { %v1867_v43 = vadd.s32 4294967294, %v545_v36  ;;  %v2557_v2 = vpop.eup %1959  ;;  %v457_v42 = vxor.u32 2147483648, %v456_v57  ;;  %vm615_vm1 = vcmp.lt.s32.totalorder %v2533_v40, 3  ;;  %v618_v38 = vsel %vm616_vm7, %v606_v27, 2102212464 }
 0x101   :  { %v609_v31 = vor.u32 %v608_v26, %v607_v14  ;;  %v2562_v29 = vpop.eup %1961  ;;  %v612_v53 = vor.u32 %v611_v28, %v610_v10  ;;  %v617_v9 = vsel %vm613_vm5, %v597_v55, %v600_v46  ;;  %v621_v21 = vsel %vm613_vm5, %v600_v46, %v603_v5 }
 0x102   :  { %vm1868_vm8 = vcmp.lt.s32.totalorder %v1867_v43, 0  ;;  %v619_v35 = vsel %vm615_vm1, %v603_v5, %v618_v38  ;;  %v695_v51 = vadd.s32 1, %v1873_v58  ;;  %v625_v55 = vsel %vm613_vm5, %v603_v5, %v606_v27 }
 0x103   :  { %v548_v15 = vsel %vm1868_vm8, 0, %v1867_v43  ;;  %v622_v50 = vsel %vm616_vm7, %v609_v31, 920167782  ;;  %v2572_v32 = vpop.eup %1963  ;;  %v626_v26 = vsel %vm616_vm7, %v612_v53, 1326507024  ;;  %v458_v38 = vsel %vm375_vm14, %v457_v42, %v456_v57 }
 0x104   :  { %v549_v34 = vsub.s32 32, %v548_v15  ;;  %v553_v44 = vsub.s32 4294967266, %v548_v15  ;;  %v623_v36 = vsel %vm615_vm1, %v606_v27, %v622_v50  ;;  %v550_v46 = vshll.u32 %v2531_v19, %v548_v15 }
 0x105   :  { %v624_v14 = vsel %vm614_vm6, %v621_v21, %v623_v36  ;;  %vm696_vm9 = vcmp.gt.s32.totalorder %v695_v51, 0  ;;  %v627_v10 = vsel %vm615_vm1, %v609_v31, %v626_v26  ;;  %v3204_v31 = vxor.u32 2147483648, %v2557_v2 }
 0x106   :  { %v551_v58 = vshrl.u32 %v533_v4, %v549_v34  ;;  %v554_v43 = vadd.s32 127, %v553_v44  ;;  %v697_v28 = vsel %vm696_vm9, %v695_v51, 0  ;;  %v628_v5 = vsel %vm614_vm6, %v625_v55, %v627_v10 }
 0x107   :  { %v2590_v19 = vmul.u32.u64.low %v2539_v49, %v624_v14  ;;  %v2591_v27 = vmul.u32.u64.high %v2539_v49, %v624_v14, %v2590_v19  ;;  %v620_v4 = vsel %vm614_vm6, %v617_v9, %v619_v35  ;;  %v699_v15 = vand.u32 31, %v697_v28 }
 0x108   :  { %v552_v21 = vor.u32 %v551_v58, %v550_v46  ;;  %v555_v53 = vshll.u32 %v554_v43, 23  ;;  %1965 = vsinq.f32 %v2524_v33  ;;  %vm479_vm10 = vcmp.lt.s32.totalorder %v2208_v47, 0 }
 0x109   :  { %v2600_v57 = vmul.u32.u64.low %v2539_v49, %v628_v5  ;;  %v2601_v42 = vmul.u32.u64.high %v2539_v49, %v628_v5, %v2600_v57  ;;  %v3205_v50 = vxor.u32 2147483648, %v2562_v29  ;;  %v3202_v51 = vxor.u32 2147483648, %v2572_v32 }
 0x10a   :  { %v556_v34 = vor.u32 4788187, %v555_v53  ;;  %v700_v44 = vsub.s32 32, %v699_v15  ;;  %v461_v40 = vsel %vm2500_vm3, %v2112_v25, %v458_v38  ;;  %v636_v9 = vmul.u32 %v2539_v49, %v620_v4 }
 0x10b   :  { %v639_v33 = vadd.s32 1, %v2591_v27  ;;  %v692_v35 = vand.u32 8388607, %v3201_v0  ;;  %vm2614_vm11 = vcmp.le.f32.partialorder %v477_v13, 0.7853982  ;;  %v559_v46 = vcvt.s32.f32 %v552_v21 }
 0x10c   :  { %v557_v55 = vand.u32 2147483647, %v556_v34  ;;  %v702_v14 = vshll.u32 %v3219_v59, %v699_v15  ;;  %v703_v22 = vshrl.u32 %v2042_v63, %v700_v44  ;;  %vm638_vm12 = vc.u32 %v2601_v42, %v2590_v19 }
 0x10d   :  { %v2622_v49 = vshrl.u32 %v697_v28, 5  ;;  %v705_v26 = vshll.u32 %v2042_v63, %v699_v15  ;;  %v706_v58 = vshrl.u32 %v3223_v1, %v700_v44  ;;  %v640_v13 = vsel %vm638_vm12, %v639_v33, %v2591_v27 }
 0x10e   :  { %v560_v43 = vmul.f32 %v559_v46, %v557_v55  ;;  %v704_v10 = vor.u32 %v703_v22, %v702_v14  ;;  %v708_v38 = vshll.u32 %v3223_v1, %v699_v15  ;;  %v641_v5 = vadd.s32 %v640_v13, %v636_v9 }
 0x10f   :  { %v707_v21 = vor.u32 %v706_v58, %v705_v26  ;;  %v709_v53 = vshrl.u32 %v2044_v3, %v700_v44  ;;  %v711_v4 = vshll.u32 %v2044_v3, %v699_v15  ;;  %v712_v28 = vshrl.u32 %v3211_v7, %v700_v44 }
 0x110   :  { %v561_v57 = vxor.u32 2147483648, %v560_v43  ;;  %v714_v34 = vshll.u32 %v3211_v7, %v699_v15  ;;  %v715_v0 = vshrl.u32 %v3209_v17, %v700_v44  ;;  %v563_v55 = vsub.s32 4, %v2510_v37 }
 0x111   :  { %v642_v46 = vadd.s32 536870912, %v641_v5  ;;  %v693_v27 = vor.u32 8388608, %v692_v35  ;;  %v710_v33 = vor.u32 %v709_v53, %v708_v38  ;;  %1967 = vcosq.f32 %v461_v40 }
 0x112   :  { %v562_v9 = vsel %vm479_vm10, %v561_v57, %v560_v43  ;;  %v713_v14 = vor.u32 %v712_v28, %v711_v4  ;;  %v716_v22 = vor.u32 %v715_v0, %v714_v34  ;;  %v2636_v26 = vpop.eup %1965  ;;  %vm264_vm13 = vcmp.eq.s32.totalorder %v2518_v41, 2 }
 0x113   :  { %1969 = vsinq.f32 %v461_v40  ;;  %v2639_v58 = vshrl.u32 %v642_v46, 30  ;;  %vm717_vm14 = vcmp.lt.s32.totalorder %v2622_v49, 1  ;;  %vm720_vm15 = vcmp.lt.s32.totalorder %v2622_v49, 4 }
 0x114   :  { %vm261_vm0 = vcmp.eq.s32.totalorder %v2518_v41, 0  ;;  %v701_v15 = vshrl.u32 %v3219_v59, %v700_v44  ;;  %vm718_vm2 = vcmp.lt.s32.totalorder %v2622_v49, 2  ;;  %v725_v0 = vsel %vm717_vm14, %v704_v10, %v707_v21 }
 0x115   :  { %v726_v35 = vsel %vm720_vm15, %v713_v14, 920167782  ;;  %v565_v40 = vsel %vm2614_vm11, %v2208_v47, %v562_v9  ;;  %v644_v43 = vshll.u32 %v2639_v58, 30  ;;  %vm719_vm3 = vcmp.lt.s32.totalorder %v2622_v49, 3 }
 0x116   :  { %v722_v13 = vsel %vm720_vm15, %v710_v33, 2102212464  ;;  %v727_v38 = vsel %vm719_vm3, %v710_v33, %v726_v35  ;;  %v729_v53 = vsel %vm717_vm14, %v707_v21, %v710_v33  ;;  %v730_v44 = vsel %vm720_vm15, %v716_v22, 1326507024 }
 0x117   :  { %v733_v4 = vshll.u32 %v693_v27, 8  ;;  %v2655_v57 = vsub.s32 %v641_v5, %v644_v43  ;;  %v721_v28 = vsel %vm717_vm14, %v701_v15, %v704_v10  ;;  %v728_v34 = vsel %vm718_vm2, %v725_v0, %v727_v38 }
 0x118   :  { %v731_v46 = vsel %vm719_vm3, %v713_v14, %v730_v44  ;;  %vm260_vm4 = vcmp.lt.s32.totalorder %v2518_v41, 2  ;;  %vm364_vm5 = vcmp.lt.s32.totalorder %v2526_v12, 2  ;;  %v723_v9 = vsel %vm719_vm3, %v707_v21, %v722_v13 }
 0x119   :  { %v732_v35 = vsel %vm718_vm2, %v729_v53, %v731_v46  ;;  %v2665_v33 = vmul.u32.u64.low %v733_v4, %v728_v34  ;;  %v2666_v22 = vmul.u32.u64.high %v733_v4, %v728_v34, %v2665_v33  ;;  %v3203_v5 = vxor.u32 2147483648, %v2636_v26 }
 0x11a   :  { %v647_v10 = vsub.s32 0, %v2655_v57  ;;  %v2671_v27 = vmul.u32.u64.low %v733_v4, %v732_v35  ;;  %v2672_v15 = vmul.u32.u64.high %v733_v4, %v732_v35, %v2671_v27  ;;  %vm365_vm6 = vcmp.eq.s32.totalorder %v2526_v12, 0 }
 0x11b   :  { %vm368_vm7 = vcmp.eq.s32.totalorder %v2526_v12, 2  ;;  %v2677_v21 = vand.u32 3, %v2529_v6  ;;  %v564_v14 = vsel %vm479_vm10, %v563_v55, %v2510_v37  ;;  %1971 = vcosq.f32 %v565_v40  ;;  %v2686_v38 = vpop.eup %1967 }
 0x11c   :  { %v1870_v0 = vmin.u32 %v647_v10, %v2655_v57  ;;  %v724_v43 = vsel %vm718_vm2, %v721_v28, %v723_v9  ;;  %v792_v13 = vand.u32 2139095040, %v2484_v61  ;;  %3241 = vst [vmem:[#allocation13_spill] sm:$0xff] %v2686_v38  ;;  %v266_v6 = vsel %vm264_vm13, %v3204_v31, %v2562_v29 }
 0x11d   :  { %1973 = vsinq.f32 %v565_v40  ;;  %v743_v53 = vadd.s32 1, %v2666_v22  ;;  %v3206_v37 = vand.u32 2147483647, %v2484_v61  ;;  %v2695_v55 = vpop.eup %1969  ;;  %v263_v49 = vsel %vm261_vm0, %v2557_v2, %v3205_v50 }
 0x11e   :  { %3242 = vst [vmem:[#allocation14_spill] sm:$0xff] %v2695_v55  ;;  %v367_v44 = vsel %vm365_vm6, %v2572_v32, %v3203_v5  ;;  %v370_v40 = vsel %vm368_vm7, %v3202_v51, %v2636_v26  ;;  %v649_v28 = vclz %v1870_v0  ;;  %vm469_vm1 = vcmp.eq.s32.totalorder %v2677_v21, 0 }
 0x11f   :  { %vm472_vm8 = vcmp.eq.s32.totalorder %v2677_v21, 2  ;;  %v2716_v34 = vsel %vm2614_vm11, 0, %v564_v14  ;;  %v740_v46 = vmul.u32 %v733_v4, %v724_v43  ;;  %vm742_vm9 = vc.u32 %v2672_v15, %v2665_v33 }
 0x120   :  { %v793_v9 = vshrl.u32 %v792_v13, 23  ;;  %vm2722_vm10 = vcmp.le.f32.partialorder %v581_v54, 0.7853982  ;;  %vm583_vm12 = vcmp.lt.s32.totalorder %v2382_v11, 0  ;;  %v1871_v10 = vadd.s32 4294967294, %v649_v28 }
 0x121   :  { %v744_v27 = vsel %vm742_vm9, %v743_v53, %v2666_v22  ;;  %v667_v36 = vsub.s32 4, %v2639_v58  ;;  %v796_v4 = vand.u32 8388607, %v3206_v37  ;;  %v2733_v43 = vsel %vm260_vm4, %v263_v49, %v266_v6 }
 0x122   :  { %v745_v14 = vadd.s32 %v744_v27, %v740_v46  ;;  %v1877_v0 = vadd.s32 4294967169, %v793_v9  ;;  %v2737_v54 = vsel %vm364_vm5, %v367_v44, %v370_v40  ;;  %v570_v13 = vadd.s32 3, %v2716_v34 }
 0x123   :  { %vm1872_vm11 = vcmp.lt.s32.totalorder %v1871_v10, 0  ;;  %v3207_v22 = vxor.u32 2147483648, %v2686_v38  ;;  %v3208_v9 = vxor.u32 2147483648, %v2695_v55  ;;  %v637_v27 = vadd.s32 %v2590_v19, %v2601_v42 }
 0x124   :  { %v652_v53 = vsel %vm1872_vm11, 0, %v1871_v10  ;;  %v746_v28 = vadd.s32 536870912, %v745_v14  ;;  %v799_v46 = vadd.s32 1, %v1877_v0  ;;  %v668_v12 = vsel %vm583_vm12, %v667_v36, %v2639_v58 }
 0x125   :  { %v653_v41 = vsub.s32 32, %v652_v53  ;;  %v657_v6 = vsub.s32 4294967266, %v652_v53  ;;  %v797_v44 = vor.u32 8388608, %v796_v4  ;;  %v2747_v40 = vpop.eup %1971  ;;  %v654_v10 = vshll.u32 %v2655_v57, %v652_v53 }
 0x126   :  { %v747_v49 = vshrl.u32 %v746_v28, 30  ;;  %vm800_vm13 = vcmp.gt.s32.totalorder %v799_v46, 0  ;;  %v2752_v50 = vand.u32 3, %v570_v13  ;;  %v896_v37 = vand.u32 2139095040, %v2516_v48 }
 0x127   :  { %v655_v51 = vshrl.u32 %v637_v27, %v653_v41  ;;  %v658_v0 = vadd.s32 127, %v657_v6  ;;  %v801_v5 = vsel %vm800_vm13, %v799_v46, 0  ;;  %v2750_v31 = vpop.eup %1973  ;;  %v2760_v58 = vsel %vm469_vm1, %v2686_v38, %v3208_v9 }
 0x128   :  { %v748_v19 = vshll.u32 %v747_v49, 30  ;;  %v803_v42 = vand.u32 31, %v801_v5  ;;  %v2767_v57 = vsel %vm472_vm8, %v3207_v22, %v2695_v55  ;;  %vm687_vm14 = vcmp.lt.s32.totalorder %v2386_v30, 0 }
 0x129   :  { %v656_v36 = vor.u32 %v655_v51, %v654_v10  ;;  %v659_v4 = vshll.u32 %v658_v0, 23  ;;  %v2772_v13 = vsel %vm2722_vm10, 0, %v668_v12  ;;  %v741_v53 = vadd.s32 %v2665_v33, %v2672_v15 }
 0x12a   :  { %v2776_v28 = vsub.s32 %v745_v14, %v748_v19  ;;  %v804_v46 = vsub.s32 32, %v803_v42  ;;  %v2780_v22 = vshll.u32 %v797_v44, 8  ;;  %v771_v10 = vsub.s32 4, %v747_v49 }
 0x12b   :  { %v660_v6 = vor.u32 4788187, %v659_v4  ;;  %v897_v12 = vshrl.u32 %v896_v37, 23  ;;  %v663_v17 = vcvt.s32.f32 %v656_v36  ;;  %v806_v19 = vshll.u32 %v3219_v59, %v803_v42 }
 0x12c   :  { %v751_v51 = vsub.s32 0, %v2776_v28  ;;  %v807_v0 = vshrl.u32 %v2042_v63, %v804_v46  ;;  %v810_v33 = vshrl.u32 %v3223_v1, %v804_v46  ;;  %v813_v15 = vshrl.u32 %v2044_v3, %v804_v46 }
 0x12d   :  { %v661_v9 = vand.u32 2147483647, %v660_v6  ;;  %v809_v4 = vshll.u32 %v2042_v63, %v803_v42  ;;  %v812_v44 = vshll.u32 %v3223_v1, %v803_v42  ;;  %v802_v27 = vshrl.u32 %v801_v5, 5 }
 0x12e   :  { %v1874_v14 = vmin.u32 %v751_v51, %v2776_v28  ;;  %v815_v7 = vshll.u32 %v2044_v3, %v803_v42  ;;  %v3245_v62 = vmov 920167782   ;;  %v808_v36 = vor.u32 %v807_v0, %v806_v19 }
 0x12f   :  { %v664_v41 = vmul.f32 %v663_v17, %v661_v9  ;;  %v816_v37 = vshrl.u32 %v3245_v62, %v804_v46  ;;  %v811_v39 = vor.u32 %v810_v33, %v809_v4  ;;  %v814_v45 = vor.u32 %v813_v15, %v812_v44 }
 0x130   :  { %v753_v6 = vclz %v1874_v14  ;;  %v818_v51 = vshll.u32 %v3245_v62, %v803_v42  ;;  %v3246_v38 = vmov 1326507024   ;;  %v772_v1 = vsel %vm687_vm14, %v771_v10, %v747_v49 }
 0x131   :  { %v665_v20 = vxor.u32 2147483648, %v664_v41  ;;  %v817_v18 = vor.u32 %v816_v37, %v815_v7  ;;  %v819_v59 = vshrl.u32 %v3246_v38, %v804_v46  ;;  %v3247_v17 = vmov 683565275  }
 0x132   :  { %v1875_v55 = vadd.s32 4294967294, %v753_v6  ;;  %v805_v5 = vshrl.u32 %v3247_v17, %v804_v46  ;;  %v1881_v9 = vadd.s32 4294967169, %v897_v12  ;;  %vm573_vm15 = vcmp.eq.s32.totalorder %v2752_v50, 0 }
 0x133   :  { %vm576_vm0 = vcmp.eq.s32.totalorder %v2752_v50, 2  ;;  %v666_v0 = vsel %vm583_vm12, %v665_v20, %v664_v41  ;;  %v820_v33 = vor.u32 %v819_v59, %v818_v51  ;;  %vm821_vm2 = vcmp.lt.s32.totalorder %v802_v27, 1 }
 0x134   :  { %vm824_vm3 = vcmp.lt.s32.totalorder %v802_v27, 4  ;;  %v3248_v7 = vand.u32 2147483647, %v2386_v30  ;;  %vm1876_vm5 = vcmp.lt.s32.totalorder %v1875_v55, 0  ;;  %vm822_vm6 = vcmp.lt.s32.totalorder %v802_v27, 2 }
 0x135   :  { %vm823_vm7 = vcmp.lt.s32.totalorder %v802_v27, 3  ;;  %v826_v49 = vsel %vm824_vm3, %v814_v45, 2102212464  ;;  %v756_v46 = vsel %vm1876_vm5, 0, %v1875_v55  ;;  %v825_v10 = vsel %vm821_vm2, %v805_v5, %v808_v36 }
 0x136   :  { %vm2803_vm4 = vcmp.le.f32.partialorder %v3248_v7, 0.7853982  ;;  %v829_v12 = vsel %vm821_vm2, %v808_v36, %v811_v39  ;;  %v830_v59 = vsel %vm824_vm3, %v817_v18, 920167782  ;;  %vm468_vm1 = vcmp.lt.s32.totalorder %v2677_v21, 2 }
 0x137   :  { %v669_v20 = vsel %vm2722_vm10, %v2382_v11, %v666_v0  ;;  %v757_v41 = vsub.s32 32, %v756_v46  ;;  %v761_v15 = vsub.s32 4294967266, %v756_v46  ;;  %v827_v14 = vsel %vm823_vm7, %v811_v39, %v826_v49 }
 0x138   :  { %vm572_vm8 = vcmp.lt.s32.totalorder %v2752_v50, 2  ;;  %v758_v55 = vshll.u32 %v2776_v28, %v756_v46  ;;  %v831_v19 = vsel %vm823_vm7, %v814_v45, %v830_v59  ;;  %v833_v4 = vsel %vm821_vm2, %v811_v39, %v814_v45 }
 0x139   :  { %v834_v44 = vsel %vm824_vm3, %v820_v33, 1326507024  ;;  %vm257_vm9 = vweird.f32 %v2106_v23  ;;  %vm361_vm12 = vweird.f32 %v2109_v24  ;;  %v759_v35 = vshrl.u32 %v741_v53, %v757_v41 }
 0x13a   :  { %v762_v37 = vadd.s32 127, %v761_v15  ;;  %v832_v6 = vsel %vm822_vm6, %v829_v12, %v831_v19  ;;  %v835_v36 = vsel %vm823_vm7, %v817_v18, %v834_v44  ;;  %vm3227_vm10 = vweird.f32 %v2112_v25 }
 0x13b   :  { %v828_v28 = vsel %vm822_vm6, %v825_v10, %v827_v14  ;;  %v836_v51 = vsel %vm822_vm6, %v833_v4, %v835_v36  ;;  %v2829_v45 = vmul.u32.u64.low %v2780_v22, %v832_v6  ;;  %v2830_v39 = vmul.u32.u64.high %v2780_v22, %v832_v6, %v2829_v45 }
 0x13c   :  { %v760_v5 = vor.u32 %v759_v35, %v758_v55  ;;  %v763_v0 = vshll.u32 %v762_v37, 23  ;;  %v2834_v53 = vmul.u32.u64.low %v2780_v22, %v836_v51  ;;  %v2835_v33 = vmul.u32.u64.high %v2780_v22, %v836_v51, %v2834_v53 }
 0x13d   :  { %1975 = vcosq.f32 %v669_v20  ;;  %v674_v18 = vadd.s32 3, %v2772_v13  ;;  %v893_v7 = vand.u32 2147483647, %v2516_v48  ;;  %v903_v49 = vadd.s32 1, %v1881_v9 }
 0x13e   :  { %v3251_v27 = vxor.u32 2147483648, %v2750_v31  ;;  %v3252_v10 = vxor.u32 2147483648, %v2747_v40  ;;  %1977 = vsinq.f32 %v669_v20  ;;  %v764_v59 = vor.u32 4788187, %v763_v0 }
 0x13f   :  { %v2851_v41 = vsel %vm2803_vm4, 0, %v772_v1  ;;  %v844_v9 = vmul.u32 %v2780_v22, %v828_v28  ;;  %v847_v15 = vadd.s32 1, %v2830_v39  ;;  %vm904_vm11 = vcmp.gt.s32.totalorder %v903_v49, 0 }
 0x140   :  { %v575_v46 = vsel %vm573_vm15, %v2747_v40, %v3251_v27  ;;  %v578_v12 = vsel %vm576_vm0, %v3252_v10, %v2750_v31  ;;  %v765_v14 = vand.u32 2147483647, %v764_v59  ;;  %v767_v55 = vcvt.s32.f32 %v760_v5 }
 0x141   :  { %vm846_vm13 = vc.u32 %v2835_v33, %v2829_v45  ;;  %v905_v19 = vsel %vm904_vm11, %v903_v49, 0  ;;  %v475_v20 = vsel %vm468_vm1, %v2760_v58, %v2767_v57  ;;  %v2864_v1 = vand.u32 8388607, %v893_v7 }
 0x142   :  { %v848_v4 = vsel %vm846_vm13, %v847_v15, %v2830_v39  ;;  %v907_v22 = vand.u32 31, %v905_v19  ;;  %vm3226_vm15 = vweird.f32 %v2208_v47  ;;  %v579_v44 = vsel %vm572_vm8, %v575_v46, %v578_v12 }
 0x143   :  { %v768_v35 = vmul.f32 %v767_v55, %v765_v14  ;;  %v849_v37 = vadd.s32 %v848_v4, %v844_v9  ;;  %v2872_v6 = vsel %vm257_vm9, nan, %v2733_v43  ;;  %v2877_v21 = vsel %vm361_vm12, nan, %v2737_v54 }
 0x144   :  { %v778_v58 = vadd.s32 3, %v2851_v41  ;;  %v908_v57 = vsub.s32 32, %v907_v22  ;;  %v2882_v36 = vsel %vm3227_vm10, nan, %v475_v20  ;;  %v2884_v50 = vand.u32 3, %v674_v18 }
 0x145   :  { %v769_v28 = vxor.u32 2147483648, %v768_v35  ;;  %v850_v51 = vadd.s32 536870912, %v849_v37  ;;  %v2888_v43 = vsel %vm3226_vm15, nan, %v579_v44  ;;  %v901_v39 = vor.u32 8388608, %v2864_v1 }
 0x146   :  { %v911_v54 = vshrl.u32 %v2042_v63, %v908_v57  ;;  %v3253_v5 = vmov 2131351028   ;;  %v910_v18 = vshll.u32 %v3247_v17, %v907_v22  ;;  %v917_v27 = vshrl.u32 %v2044_v3, %v908_v57 }
 0x147   :  { %v914_v0 = vshrl.u32 %v3253_v5, %v908_v57  ;;  %v770_v53 = vsel %vm687_vm14, %v769_v28, %v768_v35  ;;  %v2895_v49 = vshrl.u32 %v850_v51, 30  ;;  %v2899_v46 = vpop.eup %1975  ;;  %v2904_v12 = vand.u32 3, %v778_v58 }
 0x148   :  { %v773_v10 = vsel %vm2803_vm4, %v2386_v30, %v770_v53  ;;  %v2906_v59 = vshrl.u32 %v905_v19, 5  ;;  %v913_v9 = vshll.u32 %v2042_v63, %v907_v22  ;;  %v2909_v15 = vpop.eup %1977  ;;  %v912_v55 = vor.u32 %v911_v54, %v910_v18 }
 0x149   :  { %1979 = vcosq.f32 %v773_v10  ;;  %v852_v14 = vshll.u32 %v2895_v49, 30  ;;  %v916_v20 = vshll.u32 %v3253_v5, %v907_v22  ;;  %vm677_vm14 = vcmp.eq.s32.totalorder %v2884_v50, 0 }
 0x14a   :  { %vm680_vm0 = vcmp.eq.s32.totalorder %v2884_v50, 2  ;;  %1981 = vsinq.f32 %v773_v10  ;;  %v915_v42 = vor.u32 %v914_v0, %v913_v9  ;;  %v919_v4 = vshll.u32 %v2044_v3, %v907_v22 }
 0x14b   :  { %v920_v19 = vshrl.u32 %v3245_v62, %v908_v57  ;;  %v2917_v1 = vsub.s32 %v849_v37, %v852_v14  ;;  %v918_v63 = vor.u32 %v917_v27, %v916_v20  ;;  %v922_v44 = vshll.u32 %v3245_v62, %v907_v22 }
 0x14c   :  { %v923_v35 = vshrl.u32 %v3246_v38, %v908_v57  ;;  %v678_v58 = vxor.u32 2147483648, %v2909_v15  ;;  %v681_v28 = vxor.u32 2147483648, %v2899_v46  ;;  %v2924_v54 = vand.u32 3, %v2463_v52 }
 0x14d   :  { %v921_v51 = vor.u32 %v920_v19, %v919_v4  ;;  %vm676_vm2 = vcmp.lt.s32.totalorder %v2884_v50, 2  ;;  %v855_v3 = vsub.s32 0, %v2917_v1  ;;  %vm925_vm3 = vcmp.lt.s32.totalorder %v2906_v59, 1 }
 0x14e   :  { %v924_v5 = vor.u32 %v923_v35, %v922_v44  ;;  %vm928_vm4 = vcmp.lt.s32.totalorder %v2906_v59, 4  ;;  %v909_v62 = vshrl.u32 %v3247_v17, %v908_v57  ;;  %vm927_vm5 = vcmp.lt.s32.totalorder %v2906_v59, 3 }
 0x14f   :  { %v933_v38 = vsel %vm925_vm3, %v912_v55, %v915_v42  ;;  %v934_v22 = vsel %vm928_vm4, %v921_v51, 920167782  ;;  %vm791_vm6 = vcmp.lt.s32.totalorder %v2484_v61, 0  ;;  %v1878_v52 = vmin.u32 %v855_v3, %v2917_v1 }
 0x150   :  { %vm926_vm7 = vcmp.lt.s32.totalorder %v2906_v59, 2  ;;  %v930_v37 = vsel %vm928_vm4, %v918_v63, 2102212464  ;;  %v935_v0 = vsel %vm927_vm5, %v918_v63, %v934_v22  ;;  %v937_v17 = vsel %vm925_vm3, %v915_v42, %v918_v63 }
 0x151   :  { %v936_v53 = vsel %vm926_vm7, %v933_v38, %v935_v0  ;;  %v938_v57 = vsel %vm928_vm4, %v924_v5, 1326507024  ;;  %v941_v18 = vshll.u32 %v901_v39, 8  ;;  %vm3225_vm1 = vweird.f32 %v2382_v11 }
 0x152   :  { %v857_v27 = vclz %v1878_v52  ;;  %v929_v10 = vsel %vm925_vm3, %v909_v62, %v912_v55  ;;  %vm1092_vm8 = vcmp.eq.s32.totalorder %v2924_v54, 0  ;;  %v2948_v9 = vand.u32 3, %v2477_v16 }
 0x153   :  { %vm781_vm11 = vcmp.eq.s32.totalorder %v2904_v12, 0  ;;  %vm784_vm13 = vcmp.eq.s32.totalorder %v2904_v12, 2  ;;  %v931_v14 = vsel %vm927_vm5, %v915_v42, %v930_v37  ;;  %v939_v39 = vsel %vm927_vm5, %v921_v51, %v938_v57  ;;  %v2960_v55 = vpop.eup %1979 }
 0x154   :  { %v2956_v20 = vmul.u32.u64.low %v941_v18, %v936_v53  ;;  %v2957_v4 = vmul.u32.u64.high %v941_v18, %v936_v53, %v2956_v20  ;;  %v679_v16 = vsel %vm677_vm14, %v2899_v46, %v678_v58  ;;  %v682_v42 = vsel %vm680_vm0, %v681_v28, %v2909_v15  ;;  %v2980_v51 = vpop.eup %1981 }
 0x155   :  { %v3254_v19 = vand.u32 2147483647, %v2484_v61  ;;  %v1879_v44 = vadd.s32 4294967294, %v857_v27  ;;  %v940_v35 = vsel %vm926_vm7, %v937_v17, %v939_v39  ;;  %v845_v3 = vadd.s32 %v2829_v45, %v2835_v33 }
 0x156   :  { %v875_v5 = vsub.s32 4, %v2895_v49  ;;  %v2985_v62 = vmul.u32.u64.low %v941_v18, %v940_v35  ;;  %v2986_v38 = vmul.u32.u64.high %v941_v18, %v940_v35, %v2985_v62  ;;  %vm780_vm14 = vcmp.lt.s32.totalorder %v2904_v12, 2 }
 0x157   :  { %vm2974_vm3 = vcmp.le.f32.partialorder %v3254_v19, 0.7853982  ;;  %vm1880_vm0 = vcmp.lt.s32.totalorder %v1879_v44, 0  ;;  %v932_v22 = vsel %vm926_vm7, %v929_v10, %v931_v14  ;;  %v3257_v52 = vxor.u32 2147483648, %v2562_v29 }
 0x158   :  { %vm1095_vm4 = vcmp.eq.s32.totalorder %v2924_v54, 2  ;;  %v683_v45 = vsel %vm676_vm2, %v679_v16, %v682_v42  ;;  %v860_v33 = vsel %vm1880_vm0, 0, %v1879_v44  ;;  %v951_v0 = vadd.s32 1, %v2957_v4 }
 0x159   :  { %v1094_v37 = vsel %vm1092_vm8, %v2557_v2, %v3257_v52  ;;  %v3258_v53 = vxor.u32 2147483648, %v2557_v2  ;;  %v782_v59 = vxor.u32 2147483648, %v2980_v51  ;;  %v785_v57 = vxor.u32 2147483648, %v2960_v55 }
 0x15a   :  { %v861_v27 = vsub.s32 32, %v860_v33  ;;  %v865_v10 = vsub.s32 4294967266, %v860_v33  ;;  %v876_v14 = vsel %vm791_vm6, %v875_v5, %v2895_v49  ;;  %v948_v39 = vmul.u32 %v941_v18, %v932_v22 }
 0x15b   :  { %v1097_v17 = vsel %vm1095_vm4, %v3258_v53, %v2562_v29  ;;  %vm950_vm2 = vc.u32 %v2986_v38, %v2956_v20  ;;  %vm1091_vm5 = vcmp.lt.s32.totalorder %v2924_v54, 2  ;;  %v862_v50 = vshll.u32 %v2917_v1, %v860_v33 }
 0x15c   :  { %v863_v2 = vshrl.u32 %v845_v3, %v861_v27  ;;  %v866_v29 = vadd.s32 127, %v865_v10  ;;  %v952_v16 = vsel %vm950_vm2, %v951_v0, %v2957_v4  ;;  %v3015_v42 = vsel %vm3225_vm1, nan, %v683_v45 }
 0x15d   :  { %v953_v19 = vadd.s32 %v952_v16, %v948_v39  ;;  %v1098_v44 = vsel %vm1091_vm5, %v1094_v37, %v1097_v17  ;;  %v1296_v49 = vand.u32 3, %v2508_v60  ;;  %v783_v54 = vsel %vm781_vm11, %v2960_v55, %v782_v59 }
 0x15e   :  { %v786_v1 = vsel %vm784_vm13, %v785_v57, %v2980_v51  ;;  %v864_v18 = vor.u32 %v863_v2, %v862_v50  ;;  %v867_v4 = vshll.u32 %v866_v29, 23  ;;  %v3030_v35 = vsel %vm2974_vm3, 0, %v876_v14  ;;  %v3267_v14 = vld [vmem:[#allocation14_spill] sm:$0xff]  ;;  %v3269_v50 = vld [vmem:[#allocation13_spill] sm:$0xff] }
 0x15f   :  { %v954_v3 = vadd.s32 536870912, %v953_v19  ;;  %vm1195_vm7 = vcmp.eq.s32.totalorder %v2948_v9, 0  ;;  %v1399_v60 = vand.u32 3, %v2716_v34  ;;  %v3036_v62 = vsel %vm257_vm9, nan, %v1098_v44  ;;  %v3274_v44 = vld [vmem:[#allocation9_spill] sm:$0xff] }
 0x160   :  { %v868_v5 = vor.u32 4788187, %v867_v4  ;;  %vm1194_vm8 = vcmp.lt.s32.totalorder %v2948_v9, 2  ;;  %v3259_v22 = vxor.u32 2147483648, %v2636_v26  ;;  %vm777_vm11 = vweird.f32 %v2386_v30 }
 0x161   :  { %v787_v37 = vsel %vm780_vm14, %v783_v54, %v786_v1  ;;  %v3045_v45 = vshrl.u32 %v954_v3, 30  ;;  %vm1198_vm13 = vcmp.eq.s32.totalorder %v2948_v9, 2  ;;  %v1502_v34 = vand.u32 3, %v2772_v13 }
 0x162   :  { %v1197_v52 = vsel %vm1195_vm7, %v2572_v32, %v3259_v22  ;;  %v3260_v23 = vand.u32 1, %v2239_v8  ;;  %v3263_v0 = vand.u32 1, %v2267_v56  ;;  %v869_v12 = vand.u32 2147483647, %v868_v5  ;;  %v3270_v56 = vld [vmem:[#allocation8_spill] sm:$0xff] }
 0x163   :  { %v871_v17 = vcvt.s32.f32 %v864_v18  ;;  %v3266_v27 = vxor.u32 2147483648, %v2572_v32  ;;  %vm1298_vm14 = vcmp.eq.s32.totalorder %v1296_v49, 0  ;;  %v956_v13 = vshll.u32 %v3045_v45, 30 }
 0x164   :  { %vm3051_vm9 = vcmp.eq.s32.totalorder %v3260_v23, 0  ;;  %vm3057_vm0 = vcmp.eq.s32.totalorder %v3263_v0, 0  ;;  %v3268_v39 = vxor.u32 2147483648, %v3267_v14  ;;  %vm1301_vm4 = vcmp.eq.s32.totalorder %v1296_v49, 2  ;;  %v3284_v0 = vld [vmem:[#allocation11_spill] sm:$0xff] }
 0x165   :  { %v1200_v10 = vsel %vm1198_vm13, %v3266_v27, %v2636_v26  ;;  %vm1401_vm2 = vcmp.eq.s32.totalorder %v1399_v60, 0  ;;  %v3271_v29 = vand.u32 1, %v3270_v56  ;;  %v3275_v54 = vand.u32 1, %v3274_v44  ;;  %v3278_v26 = vld [vmem:[#allocation10_spill] sm:$0xff] }
 0x166   :  { %v1300_v2 = vsel %vm1298_vm14, %v3269_v50, %v3268_v39  ;;  %v3279_v1 = vand.u32 1, %v3278_v26  ;;  %v872_v4 = vmul.f32 %v871_v17, %v869_v12  ;;  %v3282_v3 = vxor.u32 2147483648, %v3269_v50 }
 0x167   :  { %vm3070_vm5 = vcmp.eq.s32.totalorder %v3271_v29, 0  ;;  %vm3076_vm7 = vcmp.eq.s32.totalorder %v3275_v54, 0  ;;  %v3283_v22 = vxor.u32 2147483648, %v2750_v31  ;;  %vm1404_vm14 = vcmp.eq.s32.totalorder %v1399_v60, 2 }
 0x168   :  { %vm3082_vm13 = vcmp.eq.s32.totalorder %v3279_v1, 0  ;;  %v1303_v5 = vsel %vm1301_vm4, %v3282_v3, %v3267_v14  ;;  %v3285_v27 = vand.u32 1, %v3284_v0  ;;  %v3098_v56 = vsub.s32 %v953_v19, %v956_v13 }
 0x169   :  { %v1403_v23 = vsel %vm1401_vm2, %v2747_v40, %v3283_v22  ;;  %v3288_v12 = vxor.u32 2147483648, %v2747_v40  ;;  %vm1504_vm15 = vcmp.eq.s32.totalorder %v1502_v34, 0  ;;  %vm1507_vm10 = vcmp.eq.s32.totalorder %v1502_v34, 2 }
 0x16a   :  { %vm3094_vm1 = vcmp.eq.s32.totalorder %v3285_v27, 0  ;;  %v873_v14 = vxor.u32 2147483648, %v872_v4  ;;  %v1506_v50 = vsel %vm1504_vm15, %v2899_v46, %v678_v58  ;;  %v1509_v29 = vsel %vm1507_vm10, %v681_v28, %v2909_v15 }
 0x16b   :  { %v1406_v17 = vsel %vm1404_vm14, %v3288_v12, %v2750_v31  ;;  %v1605_v44 = vand.u32 3, %v2851_v41  ;;  %v959_v19 = vsub.s32 0, %v3098_v56  ;;  %v1201_v13 = vsel %vm1194_vm8, %v1197_v52, %v1200_v10 }
 0x16c   :  { %vm1297_vm4 = vcmp.lt.s32.totalorder %v1296_v49, 2  ;;  %vm1400_vm2 = vcmp.lt.s32.totalorder %v1399_v60, 2  ;;  %v874_v31 = vsel %vm791_vm6, %v873_v14, %v872_v4  ;;  %vm1503_vm14 = vcmp.lt.s32.totalorder %v1502_v34, 2 }
 0x16d   :  { %v1304_v40 = vsel %vm1297_vm4, %v1300_v2, %v1303_v5  ;;  %v1407_v54 = vsel %vm1400_vm2, %v1403_v23, %v1406_v17  ;;  %v877_v46 = vsel %vm2974_vm3, %v2484_v61, %v874_v31  ;;  %v1882_v15 = vmin.u32 %v959_v19, %v3098_v56 }
 0x16e   :  { %v1510_v41 = vsel %vm1503_vm14, %v1506_v50, %v1509_v29  ;;  %vm1607_vm10 = vcmp.eq.s32.totalorder %v1605_v44, 0  ;;  %v788_v58 = vsel %vm777_vm11, nan, %v787_v37  ;;  %1983 = vcosq.f32 %v877_v46 }
 0x16f   :  { %v1202_v28 = vsel %vm361_vm12, nan, %v1201_v13  ;;  %v1609_v9 = vsel %vm1607_vm10, %v2960_v55, %v782_v59  ;;  %1985 = vsinq.f32 %v877_v46  ;;  %v961_v49 = vclz %v1882_v15 }
 0x170   :  { %vm3289_vm15 = vweird.f32 %v2112_v25  ;;  %vm1610_vm6 = vcmp.eq.s32.totalorder %v1605_v44, 2  ;;  %vm3290_vm3 = vweird.f32 %v2208_v47  ;;  %vm3291_vm8 = vweird.f32 %v2382_v11 }
 0x171   :  { %v1305_v63 = vsel %vm3289_vm15, nan, %v1304_v40  ;;  %v1408_v60 = vsel %vm3290_vm3, nan, %v1407_v54  ;;  %v1511_v52 = vsel %vm3291_vm8, nan, %v1510_v41  ;;  %vm1606_vm4 = vcmp.lt.s32.totalorder %v1605_v44, 2 }
 0x172   :  { %v1612_v24 = vsel %vm1610_vm6, %v785_v57, %v2980_v51  ;;  %v1883_v37 = vadd.s32 4294967294, %v961_v49  ;;  %v1821_v25 = vsel %vm3051_vm9, %v2872_v6, %v3036_v62  ;;  %v1822_v47 = vsel %vm3057_vm0, %v2877_v21, %v1202_v28  ;;  %v3292_v51 = vld [vmem:[#allocation12_spill] sm:$0xff] }
 0x173   :  { %v1613_v34 = vsel %vm1606_vm4, %v1609_v9, %v1612_v24  ;;  %v882_v59 = vadd.s32 3, %v3030_v35  ;;  %1829 = vst [vmem:[#allocation5] sm:$0xff] %v1821_v25  ;;  %1830 = vst [vmem:[#allocation5 + $0x8] sm:$0xff] %v1822_v47  ;;  %v1823_v55 = vsel %vm3070_vm5, %v2882_v36, %v1305_v63  ;;  %v1824_v6 = vsel %vm3076_vm7, %v2888_v43, %v1408_v60 }
 0x174   :  { %v1614_v11 = vsel %vm777_vm11, nan, %v1613_v34  ;;  %vm1884_vm12 = vcmp.lt.s32.totalorder %v1883_v37, 0  ;;  %v1825_v21 = vsel %vm3082_vm13, %v3015_v42, %v1511_v52  ;;  %v155_v57 = vand.u32 1, %v3292_v51  ;;  %1831 = vst [vmem:[#allocation5 + $0x10] sm:$0xff] %v1823_v55  ;;  %1832 = vst [vmem:[#allocation5 + $0x18] sm:$0xff] %v1824_v6 }
 0x175   :  { %v964_v62 = vsel %vm1884_vm12, 0, %v1883_v37  ;;  %v1826_v30 = vsel %vm3094_vm1, %v788_v58, %v1614_v11  ;;  %1833 = vst [vmem:[#allocation5 + $0x20] sm:$0xff] %v1825_v21  ;;  %v949_v36 = vadd.s32 %v2956_v20, %v2986_v38  ;;  %v883_v43 = vand.u32 3, %v882_v59 }
 0x176   :  { %v965_v33 = vsub.s32 32, %v964_v62  ;;  %v969_v53 = vsub.s32 4294967266, %v964_v62  ;;  %1834 = vst [vmem:[#allocation5 + $0x28] sm:$0xff] %v1826_v30  ;;  %v1708_v10 = vand.u32 3, %v3030_v35  ;;  %v966_v42 = vshll.u32 %v3098_v56, %v964_v62 }
 0x177   :  { %vm3161_vm11 = vcmp.eq.s32.totalorder %v155_v57, 0  ;;  %vm881_vm1 = vweird.f32 %v2484_v61  ;;  %vm885_vm9 = vcmp.eq.s32.totalorder %v883_v43, 0  ;;  %vm888_vm0 = vcmp.eq.s32.totalorder %v883_v43, 2 }
 0x178   :  { %v967_v2 = vshrl.u32 %v949_v36, %v965_v33  ;;  %v970_v16 = vadd.s32 127, %v969_v53  ;;  %v1984_v32 = vpop.eup %1983  ;;  %vm1713_vm5 = vcmp.eq.s32.totalorder %v1708_v10, 2  ;;  %vm1710_vm7 = vcmp.eq.s32.totalorder %v1708_v10, 0 }
 0x179   :  { %v1986_v1 = vpop.eup %1985  ;;  %v889_v18 = vxor.u32 2147483648, %v1984_v32  ;;  %vm884_vm13 = vcmp.lt.s32.totalorder %v883_v43, 2  ;;  %vm1709_vm2 = vcmp.lt.s32.totalorder %v1708_v10, 2  ;;  %v979_v50 = vsub.s32 4, %v3045_v45 }
 0x17a   :  { %v968_v20 = vor.u32 %v967_v2, %v966_v42  ;;  %v971_v38 = vshll.u32 %v970_v16, 23  ;;  %v886_v4 = vxor.u32 2147483648, %v1986_v1  ;;  %vm895_vm14 = vcmp.lt.s32.totalorder %v2516_v48, 0 }
 0x17b   :  { %v890_v35 = vsel %vm888_vm0, %v889_v18, %v1986_v1  ;;  %v1715_v5 = vsel %vm1713_vm5, %v889_v18, %v1986_v1  ;;  %vm894_vm10 = vcmp.le.f32.partialorder %v893_v7, 0.7853982  ;;  %v980_v13 = vsel %vm895_vm14, %v979_v50, %v3045_v45 }
 0x17c   :  { %v972_v3 = vor.u32 4788187, %v971_v38  ;;  %v887_v22 = vsel %vm885_vm9, %v1984_v32, %v886_v4  ;;  %v1712_v23 = vsel %vm1710_vm7, %v1984_v32, %v886_v4  ;;  %v975_v39 = vcvt.s32.f32 %v968_v20 }
 0x17d   :  { %v891_v0 = vsel %vm884_vm13, %v887_v22, %v890_v35  ;;  %v1716_v56 = vsel %vm1709_vm2, %v1712_v23, %v1715_v5  ;;  %v982_v61 = vsel %vm894_vm10, 0, %v980_v13  ;;  %v148_v40 = vadd.s32 896, %v2239_v8 }
 0x17e   :  { %v973_v27 = vand.u32 2147483647, %v972_v3  ;;  %v892_v12 = vsel %vm881_vm1, nan, %v891_v0  ;;  %v1717_v17 = vsel %vm881_vm1, nan, %v1716_v56  ;;  %v986_v54 = vadd.s32 3, %v982_v61 }
 0x17f   :  { %v1827_v29 = vsel %vm3161_vm11, %v892_v12, %v1717_v17  ;;  %v156_v46 = vand.u32 1, %v148_v40  ;;  %v1811_v41 = vand.u32 3, %v982_v61  ;;  %vm985_vm1 = vweird.f32 %v2516_v48 }
 0x180   :  { %v976_v14 = vmul.f32 %v975_v39, %v973_v27  ;;  %1835 = vst [vmem:[#allocation5 + $0x30] sm:$0xff] %v1827_v29  ;;  %v987_v15 = vand.u32 3, %v986_v54 }
 0x181   :  { %vm3179_vm15 = vcmp.eq.s32.totalorder %v156_v46, 0  ;;  %vm1816_vm3 = vcmp.eq.s32.totalorder %v1811_v41, 2  ;;  %vm1813_vm4 = vcmp.eq.s32.totalorder %v1811_v41, 0  ;;  %vm1812_vm11 = vcmp.lt.s32.totalorder %v1811_v41, 2 }
 0x182   :  { %v977_v44 = vxor.u32 2147483648, %v976_v14  ;;  %vm992_vm6 = vcmp.eq.s32.totalorder %v987_v15, 2  ;;  %vm989_vm8 = vcmp.eq.s32.totalorder %v987_v15, 0  ;;  %vm988_vm12 = vcmp.lt.s32.totalorder %v987_v15, 2 }
 0x184   :  { %v978_v19 = vsel %vm895_vm14, %v977_v44, %v976_v14 }
 0x185   :  { %v981_v31 = vsel %vm894_vm10, %v2516_v48, %v978_v19 }
 0x186   :  { %1987 = vcosq.f32 %v981_v31 }
 0x187   :  { %1989 = vsinq.f32 %v981_v31 }
 0x190   :  { %v1988_v58 = vpop.eup %1987 }
 0x191   :  { %v1990_v28 = vpop.eup %1989  ;;  %v993_v9 = vxor.u32 2147483648, %v1988_v58 }
 0x192   :  { %v990_v7 = vxor.u32 2147483648, %v1990_v28 }
 0x193   :  { %v994_v45 = vsel %vm992_vm6, %v993_v9, %v1990_v28  ;;  %v1818_v63 = vsel %vm1816_vm3, %v993_v9, %v1990_v28 }
 0x194   :  { %v991_v8 = vsel %vm989_vm8, %v1988_v58, %v990_v7  ;;  %v1815_v60 = vsel %vm1813_vm4, %v1988_v58, %v990_v7 }
 0x195   :  { %v995_v52 = vsel %vm988_vm12, %v991_v8, %v994_v45  ;;  %v1819_v24 = vsel %vm1812_vm11, %v1815_v60, %v1818_v63 }
 0x196   :  { %v996_v37 = vsel %vm985_vm1, nan, %v995_v52  ;;  %v1820_v34 = vsel %vm985_vm1, nan, %v1819_v24 }
 0x197   :  { %v1828_v25 = vsel %vm3179_vm15, %v996_v37, %v1820_v34 }
 0x198   :  { %1836 = vst [vmem:[#allocation5 + $0x38] sm:$0xff] %v1828_v25 }
 0x199   :  { %2024 = shalt.err (!%p2021_p12)
}
 0x19a   :  { %s2025_s26 = scalar_lea.hbm %s3200_s2, 1024 }
 0x19b   :  { %p2026_p13 = scmp.ne.s32.totalorder %s3200_s2, %s2025_s26  ;;  %p2029_p0 = scmp.lt.u32.totalorder %s2025_s26, %s3200_s2 }
 0x19d   :  { %p2031_p1 = pnand %p2029_p0, %p2026_p13 }
 0x19f   :  { %2034 = shalt.err (!%p2031_p1)
}
 0x1a0   :  { %1846 = dma.vmem_to_hbm [thread:$0]  %s1844_s1, 1024, %s3200_s2, [#allocation4]  }
 0x1a1   :  { %2037 = dma.done.wait [#allocation4], 1024  }
 0x1a2   :  { %2038 = vsyncadd [#allocation4], 4294966272 }
 0x1a3   :  { %1850 = vsyncpa [#allocation3], 1 }
 0x1a4   :  { %1851 = vsyncpa [#allocation4], 1 }

</bundles_post_ra>
